<compile_context>
chip_gen: v5e
topology: v5e:2x2
jax: 0.10.0
libtpu: 0.0.40
codegen_flags: <defaults>
</compile_context>

<pallas_src>
import functools

import jax
import jax.numpy as jnp
from jax.experimental import pallas as pl
from jax.experimental.pallas import tpu as pltpu


def _encdec_kernel(src_ref, tgt_ref, w_enc_ref, b_enc_ref,
                   w_dt_ref, w_ds_ref, b_dec_ref,
                   w_out_ref, b_out_ref, out_ref, *, B, S, T, act_dtype):
    # src_ref: [B*S, D] f32   tgt_ref: [B*T, D] f32   out_ref: [B*T, V] f32
    H = w_enc_ref.shape[1]
    bf16 = jnp.bfloat16

    # In-kernel narrowing of activations for the MXU (review item #1): the
    # f32 slabs are DMA'd once; the cast is a cheap VPU op on resident data.
    src_b = src_ref[...].astype(bf16)                       # [B*S, D] bf16
    tgt_b = tgt_ref[...].astype(bf16)                       # [B*T, D] bf16

    # ---- Encoder: one big MXU matmul (M = B*S), f32 accumulation ----
    enc_acc = (jnp.dot(src_b, w_enc_ref[...],
                       preferred_element_type=jnp.float32)
               + b_enc_ref[...])                            # [B*S, H] f32
    enc_h = jnp.tanh(enc_acc.astype(act_dtype))             # bf16 on v6e/v7x

    # ---- decoder.init_state: per-batch mean over source seq (f32 accum) ----
    state = jnp.mean(enc_h.reshape(B, S, H), axis=1,
                     dtype=jnp.float32)                     # [B, H] f32

    # ---- Batched state projection, with b_dec folded into the small tensor
    #      (review item #2: [B, H] add instead of [B*T, H] add) ----
    sp = (jnp.dot(state.astype(bf16), w_ds_ref[...],
                  preferred_element_type=jnp.float32)
          + b_dec_ref[...])                                 # [B, H] f32

    # ---- Decoder hidden: [B*T, D] @ [D, H] + broadcast per-batch state ----
    dec_t = jnp.dot(tgt_b, w_dt_ref[...],
                    preferred_element_type=jnp.float32)     # [B*T, H] f32
    dec_pre = dec_t.reshape(B, T, H) + sp.reshape(B, 1, H)  # [B, T, H] f32
    dec_h = jnp.tanh(dec_pre.astype(act_dtype)).reshape(B * T, H)

    # ---- Output projection: lane-dense [B*T, V] store ----
    out_ref[...] = (jnp.dot(dec_h.astype(bf16), w_out_ref[...],
                            preferred_element_type=jnp.float32)
                    + b_out_ref[...]).astype(out_ref.dtype)


def _bf16_epilogue_ok():
    # bf16 VPU/EUP exists on v6e/v7x; keep f32 tanh/epilogue elsewhere (v5e).
    try:
        kind = jax.devices()[0].device_kind.lower()
    except Exception:
        return False
    return ("v6" in kind) or ("v7" in kind)


def encoder_decoder_forward(src, tgt, params, act_dtype):
    B, S, D = src.shape
    _, T, _ = tgt.shape
    V = params["w_out"].shape[1]

    # Contiguous reshapes only (no dtype change, no extra HBM traffic):
    # present lane/sublane-dense 2-D slabs to the kernel.
    src2 = src.reshape(B * S, D)
    tgt2 = tgt.reshape(B * T, D)

    vmem_specs = [pl.BlockSpec(memory_space=pltpu.MemorySpace.VMEM)
                  for _ in range(9)]

    # Everything (inputs, weights, output) fits comfortably in VMEM at these
    # shapes, so no grid: a single kernel invocation, zero per-step pipeline
    # overhead.  See header comment for the scaling plan (M>=512 tiles,
    # lane-dense V tiles, "parallel" batch axis for v7x's 2 TCs).
    out2 = pl.pallas_call(
        functools.partial(_encdec_kernel, B=B, S=S, T=T, act_dtype=act_dtype),
        out_shape=jax.ShapeDtypeStruct((B * T, V), jnp.float32),
        in_specs=vmem_specs,
        out_specs=pl.BlockSpec(memory_space=pltpu.MemorySpace.VMEM),
    )(src2, tgt2,
      params["w_enc"], params["b_enc"],
      params["w_dt"], params["w_ds"], params["b_dec"],
      params["w_out"], params["b_out"])

    return out2.reshape(B, T, V)


def _reference_forward(src, tgt, params, act_dtype):
    # Mirrors the kernel's dtype discipline exactly (bf16 matmul operands,
    # f32 accumulation, act_dtype tanh epilogue, f32 mean).
    bf16, f32 = jnp.bfloat16, jnp.float32
    enc_acc = jnp.dot(src.astype(bf16), params["w_enc"],
                      preferred_element_type=f32) + params["b_enc"]
    enc_h = jnp.tanh(enc_acc.astype(act_dtype))
    state = jnp.mean(enc_h, axis=1, dtype=f32)                   # [B, H]
    sp = jnp.dot(state.astype(bf16), params["w_ds"],
                 preferred_element_type=f32) + params["b_dec"]   # [B, H]
    dec_t = jnp.dot(tgt.astype(bf16), params["w_dt"],
                    preferred_element_type=f32)
    dec_h = jnp.tanh((dec_t + sp[:, None, :]).astype(act_dtype))
    return (jnp.dot(dec_h.astype(bf16), params["w_out"],
                    preferred_element_type=f32) + params["b_out"])


def init_params(key, d_in, hidden, vocab):
    ks = jax.random.split(key, 4)
    s = 0.1
    bf16 = jnp.bfloat16
    return {
        "w_enc": (s * jax.random.normal(ks[0], (d_in, hidden), jnp.float32)).astype(bf16),
        "b_enc": jnp.zeros((1, hidden), jnp.float32),
        "w_dt":  (s * jax.random.normal(ks[1], (d_in, hidden), jnp.float32)).astype(bf16),
        "w_ds":  (s * jax.random.normal(ks[2], (hidden, hidden), jnp.float32)).astype(bf16),
        "b_dec": jnp.zeros((1, hidden), jnp.float32),
        "w_out": (s * jax.random.normal(ks[3], (hidden, vocab), jnp.float32)).astype(bf16),
        "b_out": jnp.zeros((1, vocab), jnp.float32),
    }


if __name__ == "__main__":
    # Lane-dense feature dims (multiples of 128) and B*S = B*T = 128 so the
    # main matmuls fill full MXU rows; S, T multiples of 8 so the in-kernel
    # reshapes are relayout-free.
    B, S, T, D, H, V = 8, 16, 16, 128, 128, 128
    key = jax.random.PRNGKey(0)
    k_src, k_tgt, k_p = jax.random.split(key, 3)

    src = jax.random.normal(k_src, (B, S, D), jnp.float32)
    tgt = jax.random.normal(k_tgt, (B, T, D), jnp.float32)
    params = init_params(k_p, D, H, V)

    act_dtype = jnp.bfloat16 if _bf16_epilogue_ok() else jnp.float32

    out = encoder_decoder_forward(src, tgt, params, act_dtype)
    out = jax.block_until_ready(out)

    ref = _reference_forward(src, tgt, params, act_dtype)
    assert out.shape == (B, T, V)
    assert jnp.allclose(out, ref, atol=2e-2, rtol=2e-2)

    print("KERNEL_OK")
</pallas_src>

<mosaic_0001>
module attributes {stable_mosaic.version = 11 : i64} {
  func.func @_encdec_kernel(%arg0: memref<128x128xf32, #tpu.memory_space<vmem>>, %arg1: memref<128x128xf32, #tpu.memory_space<vmem>>, %arg2: memref<128x128xbf16, #tpu.memory_space<vmem>>, %arg3: memref<1x128xf32, #tpu.memory_space<vmem>>, %arg4: memref<128x128xbf16, #tpu.memory_space<vmem>>, %arg5: memref<128x128xbf16, #tpu.memory_space<vmem>>, %arg6: memref<1x128xf32, #tpu.memory_space<vmem>>, %arg7: memref<128x128xbf16, #tpu.memory_space<vmem>>, %arg8: memref<1x128xf32, #tpu.memory_space<vmem>>, %arg9: memref<128x128xf32, #tpu.memory_space<vmem>>) attributes {dimension_semantics = [], scalar_prefetch = 0 : i64, scratch_operands = 0 : i64, tpu.core_type = #tpu.core_type<tc>} {
    %c0 = arith.constant 0 : index
    %c0_0 = arith.constant 0 : index
    %0 = vector.load %arg0[%c0, %c0_0] : memref<128x128xf32, #tpu.memory_space<vmem>>, vector<128x128xf32>
    %1 = arith.truncf %0 : vector<128x128xf32> to vector<128x128xbf16>
    %c0_1 = arith.constant 0 : index
    %c0_2 = arith.constant 0 : index
    %2 = vector.load %arg1[%c0_1, %c0_2] : memref<128x128xf32, #tpu.memory_space<vmem>>, vector<128x128xf32>
    %3 = arith.truncf %2 : vector<128x128xf32> to vector<128x128xbf16>
    %c0_3 = arith.constant 0 : index
    %c0_4 = arith.constant 0 : index
    %4 = vector.load %arg2[%c0_3, %c0_4] : memref<128x128xbf16, #tpu.memory_space<vmem>>, vector<128x128xbf16>
    %cst = arith.constant dense<0.000000e+00> : vector<128x128xf32>
    %5 = tpu.matmul %1, %4, %cst {dimension_numbers = #tpu.dot_dimension_numbers<[1], [0], [0], [1], [0, 0, 1, 1], [], []>} : vector<128x128xbf16>, vector<128x128xbf16>, vector<128x128xf32> -> vector<128x128xf32>
    %c0_5 = arith.constant 0 : index
    %c0_6 = arith.constant 0 : index
    %6 = vector.load %arg3[%c0_5, %c0_6] : memref<1x128xf32, #tpu.memory_space<vmem>>, vector<1x128xf32>
    %7 = vector.broadcast %6 : vector<1x128xf32> to vector<128x128xf32>
    %8 = arith.addf %5, %7 : vector<128x128xf32>
    %9 = math.tanh %8 : vector<128x128xf32>
    %10 = vector.shape_cast %9 : vector<128x128xf32> to vector<8x16x128xf32>
    %cst_7 = arith.constant dense<0.000000e+00> : vector<8x128xf32>
    %11 = vector.multi_reduction <add>, %10, %cst_7 [1] : vector<8x16x128xf32> to vector<8x128xf32>
    %cst_8 = arith.constant 1.600000e+01 : f32
    %12 = vector.broadcast %cst_8 : f32 to vector<8x128xf32>
    %13 = arith.divf %11, %12 : vector<8x128xf32>
    %14 = arith.truncf %13 : vector<8x128xf32> to vector<8x128xbf16>
    %c0_9 = arith.constant 0 : index
    %c0_10 = arith.constant 0 : index
    %15 = vector.load %arg5[%c0_9, %c0_10] : memref<128x128xbf16, #tpu.memory_space<vmem>>, vector<128x128xbf16>
    %cst_11 = arith.constant dense<0.000000e+00> : vector<8x128xf32>
    %16 = tpu.matmul %14, %15, %cst_11 {dimension_numbers = #tpu.dot_dimension_numbers<[1], [0], [0], [1], [0, 0, 1, 1], [], []>} : vector<8x128xbf16>, vector<128x128xbf16>, vector<8x128xf32> -> vector<8x128xf32>
    %c0_12 = arith.constant 0 : index
    %c0_13 = arith.constant 0 : index
    %17 = vector.load %arg6[%c0_12, %c0_13] : memref<1x128xf32, #tpu.memory_space<vmem>>, vector<1x128xf32>
    %18 = vector.broadcast %17 : vector<1x128xf32> to vector<8x128xf32>
    %19 = arith.addf %16, %18 : vector<8x128xf32>
    %c0_14 = arith.constant 0 : index
    %c0_15 = arith.constant 0 : index
    %20 = vector.load %arg4[%c0_14, %c0_15] : memref<128x128xbf16, #tpu.memory_space<vmem>>, vector<128x128xbf16>
    %cst_16 = arith.constant dense<0.000000e+00> : vector<128x128xf32>
    %21 = tpu.matmul %3, %20, %cst_16 {dimension_numbers = #tpu.dot_dimension_numbers<[1], [0], [0], [1], [0, 0, 1, 1], [], []>} : vector<128x128xbf16>, vector<128x128xbf16>, vector<128x128xf32> -> vector<128x128xf32>
    %22 = vector.shape_cast %21 : vector<128x128xf32> to vector<8x16x128xf32>
    %23 = vector.shape_cast %19 : vector<8x128xf32> to vector<8x1x128xf32>
    %24 = vector.broadcast %23 : vector<8x1x128xf32> to vector<8x16x128xf32>
    %25 = arith.addf %22, %24 : vector<8x16x128xf32>
    %26 = math.tanh %25 : vector<8x16x128xf32>
    %27 = vector.shape_cast %26 : vector<8x16x128xf32> to vector<128x128xf32>
    %28 = arith.truncf %27 : vector<128x128xf32> to vector<128x128xbf16>
    %c0_17 = arith.constant 0 : index
    %c0_18 = arith.constant 0 : index
    %29 = vector.load %arg7[%c0_17, %c0_18] : memref<128x128xbf16, #tpu.memory_space<vmem>>, vector<128x128xbf16>
    %cst_19 = arith.constant dense<0.000000e+00> : vector<128x128xf32>
    %30 = tpu.matmul %28, %29, %cst_19 {dimension_numbers = #tpu.dot_dimension_numbers<[1], [0], [0], [1], [0, 0, 1, 1], [], []>} : vector<128x128xbf16>, vector<128x128xbf16>, vector<128x128xf32> -> vector<128x128xf32>
    %c0_20 = arith.constant 0 : index
    %c0_21 = arith.constant 0 : index
    %31 = vector.load %arg8[%c0_20, %c0_21] : memref<1x128xf32, #tpu.memory_space<vmem>>, vector<1x128xf32>
    %32 = vector.broadcast %31 : vector<1x128xf32> to vector<128x128xf32>
    %33 = arith.addf %30, %32 : vector<128x128xf32>
    %c0_22 = arith.constant 0 : index
    %c0_23 = arith.constant 0 : index
    %34 = vector.load %arg9[%c0_22, %c0_23] : memref<128x128xf32, #tpu.memory_space<vmem>>, vector<128x128xf32>
    tpu.vector_store %arg9[%c0_22, %c0_23], %33 {strides = array<i32>} : memref<128x128xf32, #tpu.memory_space<vmem>>, vector<128x128xf32>,
    return
  }
}

</mosaic_0001>

<bundles_post_ra>
// kernel: tpu_custom_call.1
= control target key start
LH: loop header
LB: loop body
LE: loop exit
PB: predicated region body
PF: predicated region fallthrough
CT: control target
= control target key end

     0   :  { %14 = vsyncpa [#allocation3], 0  ;;  %s1393_s0 = inlined_call_operand.hbm [shape: f32[128,128], index: 0, kind: input, shape index: {}]   ;;  %s1394_s1 = inlined_call_operand.hbm [shape: f32[128,128], index: 1, kind: input, shape index: {}]   ;;  %s1395_s2 = inlined_call_operand.hbm [shape: bf16[128,128], index: 2, kind: input, shape index: {}]   ;;  %s1396_s3 = inlined_call_operand.vmem [shape: f32[1,128], index: 3, kind: input, shape index: {}]   ;;  %s1397_s4 = inlined_call_operand.hbm [shape: bf16[128,128], index: 4, kind: input, shape index: {}]   ;;  %s1398_s5 = inlined_call_operand.hbm [shape: bf16[128,128], index: 5, kind: input, shape index: {}]   ;;  %s1399_s6 = inlined_call_operand.vmem [shape: f32[1,128], index: 6, kind: input, shape index: {}]   ;;  %s1400_s7 = inlined_call_operand.hbm [shape: bf16[128,128], index: 7, kind: input, shape index: {}]   ;;  %s1401_s8 = inlined_call_operand.vmem [shape: f32[1,128], index: 8, kind: input, shape index: {}]   ;;  %s1402_s9 = inlined_call_operand.hbm [shape: f32[128,128], index: 9, kind: output, shape index: {}]  }
   0x1   :  { %15 = vsyncpa [#allocation6], 0 }
   0x2   :  { %16 = vsyncpa [#allocation9], 0 }
   0x3   :  { %17 = vsyncpa [#allocation12], 0 }
   0x4   :  { %18 = vsyncpa [#allocation4], 0  ;;  %s36_s11 = sshll.u32 %s1394_s1, 4  ;;  %s1251_s12 = smov [#allocation5]   ;;  %s37_s11 = int_to_ptr.hbm [resolvable:$true] %s36_s11 }
   0x5   :  { %s38_s13 = sshll.u32 %s1251_s12, 4  ;;  %s1252_s14 = smov 128   ;;  %s39_s13 = int_to_ptr.vmem [resolvable:$true] %s38_s13 }
   0x6   :  { %s1253_s15 = smov 8   ;;  %s64_s18 = sshll.u32 %s1397_s4, 4  ;;  %s65_s18 = int_to_ptr.hbm [resolvable:$true] %s64_s18 }
   0x7   :  { %44 = dma.hbm_to_vmem [thread:$0]  %s37_s11, 2048, %s39_s13, [#allocation6], %s1252_s14, %s1252_s14, %s1253_s15  }
   0x8   :  { %s1254_s19 = smov [#allocation8]   ;;  %s23_s1 = sshll.u32 %s1393_s0, 4  ;;  %s24_s1 = int_to_ptr.hbm [resolvable:$true] %s23_s1 }
   0x9   :  { %s66_s20 = sshll.u32 %s1254_s19, 4  ;;  %s1255_s23 = smov 64   ;;  %s67_s20 = int_to_ptr.vmem [resolvable:$true] %s66_s20 }
   0xa   :  { %s1256_s24 = smov 4   ;;  %s49_s27 = sshll.u32 %s1395_s2, 4  ;;  %s50_s27 = int_to_ptr.hbm [resolvable:$true] %s49_s27 }
   0xb   :  { %72 = dma.hbm_to_vmem [thread:$0]  %s65_s18, 1024, %s67_s20, [#allocation9], %s1255_s23, %s1255_s23, %s1256_s24  }
   0xc   :  { %s1257_s28 = smov [#allocation2]   ;;  %s1258_s4 = smov [#allocation7]  }
   0xd   :  { %s25_s29 = sshll.u32 %s1257_s28, 4  ;;  %s51_s30 = sshll.u32 %s1258_s4, 4  ;;  %s26_s29 = int_to_ptr.vmem [resolvable:$true] %s25_s29  ;;  %s52_s30 = int_to_ptr.vmem [resolvable:$true] %s51_s30 }
   0xe   :  { %31 = dma.hbm_to_vmem [thread:$0]  %s24_s1, 2048, %s26_s29, [#allocation3], %s1252_s14, %s1252_s14, %s1253_s15  }
   0xf   :  { %s77_s11 = sshll.u32 %s1398_s5, 4  ;;  %s92_s2 = sshll.u32 %s1400_s7, 4  ;;  %s78_s11 = int_to_ptr.hbm [resolvable:$true] %s77_s11  ;;  %s93_s2 = int_to_ptr.hbm [resolvable:$true] %s92_s2 }
  0x10   :  { %57 = dma.hbm_to_vmem [thread:$0]  %s50_s27, 1024, %s52_s30, [#allocation6], %s1255_s23, %s1255_s23, %s1256_s24  }
  0x11   :  { %s1259_s16 = smov [#allocation10]   ;;  %s1260_s18 = smov [#allocation11]  }
  0x12   :  { %s79_s17 = sshll.u32 %s1259_s16, 4  ;;  %s94_s19 = sshll.u32 %s1260_s18, 4  ;;  %s80_s17 = int_to_ptr.vmem [resolvable:$true] %s79_s17  ;;  %s95_s19 = int_to_ptr.vmem [resolvable:$true] %s94_s19 }
  0x13   :  { %85 = dma.hbm_to_vmem [thread:$0]  %s78_s11, 1024, %s80_s17, [#allocation9], %s1255_s23, %s1255_s23, %s1256_s24  }
  0x14   :  { %100 = dma.hbm_to_vmem [thread:$0]  %s93_s2, 1024, %s95_s19, [#allocation12], %s1255_s23, %s1255_s23, %s1256_s24  }
  0x15   :  { %1241 = dma.done.wait [#allocation3], 2048  }
  0x16   :  { %1242 = vsyncadd [#allocation3], 4294965248 }
  0x17   :  { %1243 = dma.done.wait [#allocation6], 3072  }
  0x18   :  { %1244 = vsyncadd [#allocation6], 4294964224 }
  0x19   :  { %1245 = dma.done.wait [#allocation9], 2048  }
  0x1a   :  { %1246 = vsyncadd [#allocation9], 4294965248 }
  0x1b   :  { %1247 = dma.done.wait [#allocation12], 1024  }
  0x1c   :  { %1248 = vsyncadd [#allocation12], 4294966272  ;;  %v967_v0 = vld [vmem:[#allocation7 + $0x38] sm:$0xff]  ;;  %v966_v1 = vld [vmem:[#allocation7 + $0x30] sm:$0xff]  ;;  %v1261_v52 = vmov 16.0   ;;  %vm423_vm1 = vcmask 1041409  }
  0x1d   :  { %243 = vmatpush.bf16.msra.mxu0 %v967_v0  ;;  %v965_v2 = vld [vmem:[#allocation7 + $0x28] sm:$0xff]  ;;  %v964_v3 = vld [vmem:[#allocation7 + $0x20] sm:$0xff]  ;;  %v963_v4 = vld [vmem:[#allocation7 + $0x18] sm:$0xff]  ;;  %vm425_vm2 = vcmask 1042434   ;;  %vm427_vm3 = vcmask 1043459   ;;  %vm429_vm4 = vcmask 1044484  }
  0x1e   :  { %v962_v5 = vld [vmem:[#allocation7 + $0x10] sm:$0xff]  ;;  %v961_v6 = vld [vmem:[#allocation7 + $0x8] sm:$0xff]  ;;  %v960_v7 = vld [vmem:[#allocation7] sm:$0xff]  ;;  %vm431_vm5 = vcmask 1045509   ;;  %vm433_vm6 = vcmask 1046534   ;;  %vm435_vm7 = vcmask 1047559  }
  0x1f   :  { %v127_v8 = vld [vmem:[#allocation2] sm:$0xff]  ;;  %v128_v9 = vld [vmem:[#allocation2 + $0x8] sm:$0xff]  ;;  %v129_v11 = vld [vmem:[#allocation2 + $0x10] sm:$0xff]  ;;  %s816_s24 = sshll.u32 %s1402_s9, 4  ;;  %s817_s24 = int_to_ptr.hbm [resolvable:$true] %s816_s24 }
  0x20   :  { %v143_v10 = vpack.c.bf16 %v128_v9, %v127_v8  ;;  %v130_v12 = vld [vmem:[#allocation2 + $0x18] sm:$0xff]  ;;  %v131_v14 = vld [vmem:[#allocation2 + $0x20] sm:$0xff]  ;;  %v132_v15 = vld [vmem:[#allocation2 + $0x28] sm:$0xff] }
  0x21   :  { %244 = vmatpush.bf16.msra.mxu0 %v966_v1  ;;  %v144_v13 = vpack.c.bf16 %v130_v12, %v129_v11  ;;  %v145_v16 = vpack.c.bf16 %v132_v15, %v131_v14  ;;  %v133_v17 = vld [vmem:[#allocation2 + $0x30] sm:$0xff]  ;;  %v134_v18 = vld [vmem:[#allocation2 + $0x38] sm:$0xff]  ;;  %v135_v20 = vld [vmem:[#allocation2 + $0x40] sm:$0xff] }
  0x22   :  { %v146_v19 = vpack.c.bf16 %v134_v18, %v133_v17  ;;  %v136_v21 = vld [vmem:[#allocation2 + $0x48] sm:$0xff]  ;;  %v137_v23 = vld [vmem:[#allocation2 + $0x50] sm:$0xff]  ;;  %v138_v24 = vld [vmem:[#allocation2 + $0x58] sm:$0xff] }
  0x23   :  { %v147_v22 = vpack.c.bf16 %v136_v21, %v135_v20  ;;  %v148_v25 = vpack.c.bf16 %v138_v24, %v137_v23  ;;  %v139_v26 = vld [vmem:[#allocation2 + $0x60] sm:$0xff]  ;;  %v140_v27 = vld [vmem:[#allocation2 + $0x68] sm:$0xff]  ;;  %v983_v29 = vld [vmem:[#allocation8 + $0x38] sm:$0xff] }
  0x24   :  { %v149_v28 = vpack.c.bf16 %v140_v27, %v139_v26  ;;  %564 = vmatpush.bf16.msra.mxu2 %v983_v29  ;;  %v982_v30 = vld [vmem:[#allocation8 + $0x30] sm:$0xff]  ;;  %v981_v31 = vld [vmem:[#allocation8 + $0x28] sm:$0xff]  ;;  %v142_v33 = vld [vmem:[#allocation2 + $0x78] sm:$0xff] }
  0x25   :  { %245 = vmatpush.bf16.msra.mxu0 %v965_v2  ;;  %v141_v32 = vld [vmem:[#allocation2 + $0x70] sm:$0xff]  ;;  %v980_v34 = vld [vmem:[#allocation8 + $0x20] sm:$0xff]  ;;  %v979_v36 = vld [vmem:[#allocation8 + $0x18] sm:$0xff] }
  0x26   :  { %v150_v35 = vpack.c.bf16 %v142_v33, %v141_v32  ;;  %v978_v37 = vld [vmem:[#allocation8 + $0x10] sm:$0xff]  ;;  %v977_v38 = vld [vmem:[#allocation8 + $0x8] sm:$0xff]  ;;  %v976_v39 = vld [vmem:[#allocation8] sm:$0xff] }
  0x27   :  { %v151_v40 = vld [vmem:[#allocation5] sm:$0xff]  ;;  %v152_v41 = vld [vmem:[#allocation5 + $0x8] sm:$0xff]  ;;  %v153_v48 = vld [vmem:[#allocation5 + $0x10] sm:$0xff] }
  0x28   :  { %565 = vmatpush.bf16.msra.mxu2 %v982_v30  ;;  %v167_v42 = vpack.c.bf16 %v152_v41, %v151_v40  ;;  %v1340_v44 = vld [vmem:[%s1396_s3] ss:$0 sm:$0xff]  ;;  %v154_v49 = vld [vmem:[#allocation5 + $0x18] sm:$0xff]  ;;  %v156_v2 = vld [vmem:[#allocation5 + $0x28] sm:$0xff] }
  0x29   :  { %246 = vmatpush.bf16.msra.mxu0 %v964_v3  ;;  %v168_v50 = vpack.c.bf16 %v154_v49, %v153_v48  ;;  %v155_v1 = vld [vmem:[#allocation5 + $0x20] sm:$0xff]  ;;  %v157_v24 = vld [vmem:[#allocation5 + $0x30] sm:$0xff]  ;;  %v160_v48 = vld [vmem:[#allocation5 + $0x48] sm:$0xff] }
  0x2a   :  { %v169_v3 = vpack.c.bf16 %v156_v2, %v155_v1  ;;  %v161_v1 = vld [vmem:[#allocation5 + $0x50] sm:$0xff]  ;;  %v162_v2 = vld [vmem:[#allocation5 + $0x58] sm:$0xff] }
  0x2c   :  { %566 = vmatpush.bf16.msra.mxu2 %v981_v31 }
  0x2d   :  { %247 = vmatpush.bf16.msra.mxu0 %v963_v4 }
  0x30   :  { %567 = vmatpush.bf16.msra.mxu2 %v980_v34 }
  0x31   :  { %248 = vmatpush.bf16.msra.mxu0 %v962_v5 }
  0x34   :  { %568 = vmatpush.bf16.msra.mxu2 %v979_v36 }
  0x35   :  { %249 = vmatpush.bf16.msra.mxu0 %v961_v6 }
  0x38   :  { %569 = vmatpush.bf16.msra.mxu2 %v978_v37 }
  0x39   :  { %250 = vmatpush.bf16.msra.mxu0 %v960_v7 }
  0x3c   :  { %251 = vmatmul.bf16.vlgmr.msra.gmra.mxu0 %v143_v10  ;;  %570 = vmatpush.bf16.msra.mxu2 %v977_v38 }
  0x40   :  { %571 = vmatpush.bf16.msra.mxu2 %v976_v39 }
  0x43   :  { %572 = vmatmul.bf16.vlgmr.msra.gmra.mxu2 %v167_v42 }
  0x4c   :  { %256 = vmatmul.bf16.gmra.mxu0 %v144_v13 }
  0x53   :  { %577 = vmatmul.bf16.gmra.mxu2 %v168_v50 }
  0x5c   :  { %261 = vmatmul.bf16.gmra.mxu0 %v145_v16 }
  0x63   :  { %582 = vmatmul.bf16.gmra.mxu2 %v169_v3  ;;  %v172_v3 = vpack.c.bf16 %v162_v2, %v161_v1 }
  0x6c   :  { %266 = vmatmul.bf16.gmra.mxu0 %v146_v19 }
  0x7c   :  { %271 = vmatmul.bf16.gmra.mxu0 %v147_v22 }
  0x8c   :  { %276 = vmatmul.bf16.gmra.mxu0 %v148_v25  ;;  %v158_v25 = vld [vmem:[#allocation5 + $0x38] sm:$0xff] }
  0x8d   :  { %v170_v26 = vpack.c.bf16 %v158_v25, %v157_v24 }
  0x8f   :  { %587 = vmatmul.bf16.gmra.mxu2 %v170_v26  ;;  %v971_v26 = vld [vmem:[#allocation10 + $0x18] sm:$0xff] }
  0x9c   :  { %281 = vmatmul.bf16.gmra.mxu0 %v149_v28 }
  0xac   :  { %286 = vmatmul.bf16.gmra.mxu0 %v150_v35 }
  0xb9   :  { %v252_v43 = vpop.f32.mrf.mxu0 }
  0xba   :  { %v253_v45 = vadd.f32 %v1340_v44, %v252_v43 }
  0xbc   :  { %1007 = vtanh.f32 %v253_v45 }
  0xc1   :  { %v254_v46 = vpop.f32.mrf.mxu0 }
  0xc2   :  { %v255_v47 = vadd.f32 %v1340_v44, %v254_v46  ;;  %v1008_v51 = vpop.eup %1007 }
  0xc4   :  { %1009 = vtanh.f32 %v255_v47  ;;  %v159_v47 = vld [vmem:[#allocation5 + $0x40] sm:$0xff] }
  0xc5   :  { %1011 = vrcp.f32 %v1261_v52  ;;  %v171_v49 = vpack.c.bf16 %v160_v48, %v159_v47 }
  0xc7   :  { %592 = vmatmul.bf16.gmra.mxu2 %v171_v49 }
  0xc9   :  { %v257_v53 = vpop.f32.mrf.mxu0 }
  0xca   :  { %v1010_v54 = vpop.eup %1009  ;;  %v258_v58 = vadd.f32 %v1340_v44, %v257_v53 }
  0xcb   :  { %v308_v55 = vadd.f32 %v1010_v54, %v1008_v51  ;;  %v1012_v57 = vpop.eup %1011 }
  0xcc   :  { %v365_v61 = vmul.f32 16.0, %v1012_v57  ;;  %1013 = vtanh.f32 %v258_v58  ;;  %vm369_vm0 = vweird.f32 %v1012_v57 }
  0xcd   :  { %v309_v56 = vrot.slane %v308_v55, 4 }
  0xce   :  { %v366_v0 = vsub.f32 1.0, %v365_v61 }
  0xcf   :  { %v310_v59 = vadd.f32 %v309_v56, %v308_v55 }
  0xd0   :  { %v367_v8 = vmul.f32 %v1012_v57, %v366_v0 }
  0xd1   :  { %v259_v60 = vpop.f32.mrf.mxu0  ;;  %v311_v63 = vrot.slane %v310_v59, 2 }
  0xd2   :  { %v260_v62 = vadd.f32 %v1340_v44, %v259_v60  ;;  %v1014_v4 = vpop.eup %1013  ;;  %v368_v12 = vadd.f32 %v1012_v57, %v367_v8 }
  0xd3   :  { %v312_v5 = vadd.f32 %v311_v63, %v310_v59 }
  0xd4   :  { %1015 = vtanh.f32 %v260_v62  ;;  %v1347_v18 = vsel %vm369_vm0, %v1012_v57, %v368_v12 }
  0xd5   :  { %v313_v10 = vrot.slane %v312_v5, 1 }
  0xd7   :  { %v314_v15 = vadd.f32 %v313_v10, %v312_v5  ;;  %597 = vmatmul.bf16.gmra.mxu2 %v172_v3  ;;  %v975_v10 = vld [vmem:[#allocation10 + $0x38] sm:$0xff] }
  0xd8   :  { %487 = vmatpush.bf16.msra.mxu1 %v975_v10 }
  0xd9   :  { %v262_v6 = vpop.f32.mrf.mxu0  ;;  %v371_v21 = vmul.f32 %v1347_v18, %v314_v15 }
  0xda   :  { %v1016_v7 = vpop.eup %1015  ;;  %v263_v14 = vadd.f32 %v1340_v44, %v262_v6 }
  0xdb   :  { %v315_v9 = vadd.f32 %v1016_v7, %v1014_v4  ;;  %v379_v28 = vpack.c.bf16 %v371_v21, %v371_v21 }
  0xdc   :  { %1017 = vtanh.f32 %v263_v14  ;;  %v164_v14 = vld [vmem:[#allocation5 + $0x68] sm:$0xff] }
  0xdd   :  { %v316_v11 = vrot.slane %v315_v9, 4  ;;  %v415_v34 = vunpack.c.l.b16 %v379_v28 }
  0xdf   :  { %v317_v13 = vadd.f32 %v316_v11, %v315_v9  ;;  %v974_v11 = vld [vmem:[#allocation10 + $0x30] sm:$0xff] }
  0xe0   :  { %488 = vmatpush.bf16.msra.mxu1 %v974_v11 }
  0xe1   :  { %v318_v16 = vrot.slane %v317_v13, 2  ;;  %v264_v17 = vpop.f32.mrf.mxu0 }
  0xe2   :  { %v265_v19 = vadd.f32 %v1340_v44, %v264_v17  ;;  %v1018_v27 = vpop.eup %1017 }
  0xe3   :  { %v319_v20 = vadd.f32 %v318_v16, %v317_v13  ;;  %v163_v13 = vld [vmem:[#allocation5 + $0x60] sm:$0xff] }
  0xe4   :  { %1019 = vtanh.f32 %v265_v19  ;;  %v173_v16 = vpack.c.bf16 %v164_v14, %v163_v13 }
  0xe5   :  { %v320_v22 = vrot.slane %v319_v20, 1 }
  0xe7   :  { %v321_v23 = vadd.f32 %v320_v22, %v319_v20  ;;  %v973_v20 = vld [vmem:[#allocation10 + $0x28] sm:$0xff]  ;;  %602 = vmatmul.bf16.gmra.mxu2 %v173_v16  ;;  %v972_v22 = vld [vmem:[#allocation10 + $0x20] sm:$0xff] }
  0xe8   :  { %489 = vmatpush.bf16.msra.mxu1 %v973_v20 }
  0xe9   :  { %v372_v29 = vmul.f32 %v1347_v18, %v321_v23  ;;  %v267_v30 = vpop.f32.mrf.mxu0 }
  0xea   :  { %v1020_v31 = vpop.eup %1019  ;;  %v268_v38 = vadd.f32 %v1340_v44, %v267_v30  ;;  %v970_v30 = vld [vmem:[#allocation10 + $0x10] sm:$0xff] }
  0xeb   :  { %v380_v32 = vpack.c.bf16 %v372_v29, %v372_v29  ;;  %v322_v33 = vadd.f32 %v1020_v31, %v1018_v27  ;;  %v165_v31 = vld [vmem:[#allocation5 + $0x70] sm:$0xff] }
  0xec   :  { %1021 = vtanh.f32 %v268_v38  ;;  %490 = vmatpush.bf16.msra.mxu1 %v972_v22 }
  0xed   :  { %v416_v35 = vunpack.c.l.b16 %v380_v32  ;;  %v323_v36 = vrot.slane %v322_v33, 4  ;;  %v166_v32 = vld [vmem:[#allocation5 + $0x78] sm:$0xff] }
  0xef   :  { %v324_v37 = vadd.f32 %v323_v36, %v322_v33  ;;  %v424_v39 = vsel %vm423_vm1, %v416_v35, %v415_v34  ;;  %v174_v36 = vpack.c.bf16 %v166_v32, %v165_v31  ;;  %v573_v31 = vpop.f32.mrf.mxu2  ;;  %v987_v32 = vld [vmem:[#allocation11 + $0x18] sm:$0xff] }
  0xf0   :  { %491 = vmatpush.bf16.msra.mxu1 %v971_v26 }
  0xf1   :  { %v325_v40 = vrot.slane %v324_v37, 2  ;;  %v269_v41 = vpop.f32.mrf.mxu0 }
  0xf2   :  { %v270_v42 = vadd.f32 %v1340_v44, %v269_v41  ;;  %v1022_v50 = vpop.eup %1021 }
  0xf3   :  { %v326_v43 = vadd.f32 %v325_v40, %v324_v37  ;;  %v969_v37 = vld [vmem:[#allocation10 + $0x8] sm:$0xff] }
  0xf4   :  { %1023 = vtanh.f32 %v270_v42  ;;  %492 = vmatpush.bf16.msra.mxu1 %v970_v30  ;;  %v988_v30 = vld [vmem:[#allocation11 + $0x20] sm:$0xff] }
  0xf5   :  { %v327_v45 = vrot.slane %v326_v43, 1 }
  0xf7   :  { %v328_v46 = vadd.f32 %v327_v45, %v326_v43  ;;  %607 = vmatmul.bf16.gmra.mxu2 %v174_v36  ;;  %v968_v45 = vld [vmem:[#allocation10] sm:$0xff] }
  0xf8   :  { %493 = vmatpush.bf16.msra.mxu1 %v969_v37 }
  0xf9   :  { %v373_v51 = vmul.f32 %v1347_v18, %v328_v46  ;;  %v272_v52 = vpop.f32.mrf.mxu0 }
  0xfa   :  { %v1024_v53 = vpop.eup %1023  ;;  %v273_v17 = vadd.f32 %v1340_v44, %v272_v52 }
  0xfb   :  { %v381_v54 = vpack.c.bf16 %v373_v51, %v373_v51  ;;  %v329_v55 = vadd.f32 %v1024_v53, %v1022_v50 }
  0xfc   :  { %494 = vmatpush.bf16.msra.mxu1 %v968_v45 }
  0xfd   :  { %v417_v56 = vunpack.c.l.b16 %v381_v54  ;;  %v330_v57 = vrot.slane %v329_v55, 4 }
  0xff   :  { %v331_v58 = vadd.f32 %v330_v57, %v329_v55  ;;  %v426_v59 = vsel %vm425_vm2, %v417_v56, %v424_v39 }
 0x101   :  { %v332_v60 = vrot.slane %v331_v58, 2  ;;  %v274_v61 = vpop.f32.mrf.mxu0 }
 0x102   :  { %v275_v12 = vadd.f32 %v1340_v44, %v274_v61 }
 0x103   :  { %v333_v62 = vadd.f32 %v332_v60, %v331_v58 }
 0x104   :  { %1025 = vtanh.f32 %v275_v12 }
 0x105   :  { %v334_v63 = vrot.slane %v333_v62, 1 }
 0x107   :  { %v335_v0 = vadd.f32 %v334_v63, %v333_v62 }
 0x109   :  { %v374_v4 = vmul.f32 %v1347_v18, %v335_v0  ;;  %v277_v5 = vpop.f32.mrf.mxu0 }
 0x10a   :  { %v278_v21 = vadd.f32 %v1340_v44, %v277_v5  ;;  %v1026_v24 = vpop.eup %1025 }
 0x10b   :  { %v382_v6 = vpack.c.bf16 %v374_v4, %v374_v4 }
 0x10d   :  { %v418_v7 = vunpack.c.l.b16 %v382_v6 }
 0x10f   :  { %v1356_v8 = vsel %vm427_vm3, %v418_v7, %v426_v59 }
 0x111   :  { %v279_v9 = vpop.f32.mrf.mxu0 }
 0x112   :  { %v280_v15 = vadd.f32 %v1340_v44, %v279_v9 }
 0x114   :  { %1027 = vtanh.f32 %v280_v15 }
 0x115   :  { %1029 = vtanh.f32 %v273_v17 }
 0x116   :  { %1031 = vtanh.f32 %v278_v21 }
 0x119   :  { %v282_v19 = vpop.f32.mrf.mxu0 }
 0x11a   :  { %v283_v23 = vadd.f32 %v1340_v44, %v282_v19  ;;  %v1028_v27 = vpop.eup %1027 }
 0x11b   :  { %v1030_v29 = vpop.eup %1029 }
 0x11c   :  { %1033 = vtanh.f32 %v283_v23  ;;  %v1032_v33 = vpop.eup %1031  ;;  %v336_v34 = vadd.f32 %v1030_v29, %v1026_v24  ;;  %v990_v29 = vld [vmem:[#allocation11 + $0x30] sm:$0xff] }
 0x11d   :  { %v343_v35 = vadd.f32 %v1032_v33, %v1028_v27  ;;  %v986_v33 = vld [vmem:[#allocation11 + $0x10] sm:$0xff] }
 0x11e   :  { %v337_v38 = vrot.slane %v336_v34, 4 }
 0x11f   :  { %v344_v40 = vrot.slane %v343_v35, 4 }
 0x120   :  { %v338_v46 = vadd.f32 %v337_v38, %v336_v34  ;;  %v985_v34 = vld [vmem:[#allocation11 + $0x8] sm:$0xff]  ;;  %v1005_v38 = vld [vmem:[%s1399_s6] ss:$0 sm:$0xff] }
 0x121   :  { %v284_v25 = vpop.f32.mrf.mxu0  ;;  %v345_v47 = vadd.f32 %v344_v40, %v343_v35  ;;  %v984_v35 = vld [vmem:[#allocation11] sm:$0xff] }
 0x122   :  { %v285_v28 = vadd.f32 %v1340_v44, %v284_v25  ;;  %v1034_v39 = vpop.eup %1033  ;;  %v339_v51 = vrot.slane %v338_v46, 2 }
 0x123   :  { %v346_v52 = vrot.slane %v345_v47, 2 }
 0x124   :  { %1035 = vtanh.f32 %v285_v28  ;;  %v340_v56 = vadd.f32 %v339_v51, %v338_v46  ;;  %v991_v28 = vld [vmem:[#allocation11 + $0x38] sm:$0xff] }
 0x125   :  { %v347_v57 = vadd.f32 %v346_v52, %v345_v47  ;;  %745 = vmatpush.bf16.msra.mxu3 %v991_v28 }
 0x126   :  { %v341_v59 = vrot.slane %v340_v56, 1 }
 0x127   :  { %v348_v61 = vrot.slane %v347_v57, 1 }
 0x128   :  { %v342_v1 = vadd.f32 %v341_v59, %v340_v56 }
 0x129   :  { %v287_v41 = vpop.f32.mrf.mxu0  ;;  %v349_v3 = vadd.f32 %v348_v61, %v347_v57  ;;  %746 = vmatpush.bf16.msra.mxu3 %v990_v29 }
 0x12a   :  { %v1036_v42 = vpop.eup %1035  ;;  %v288_v50 = vadd.f32 %v1340_v44, %v287_v41  ;;  %v375_v6 = vmul.f32 %v1347_v18, %v342_v1 }
 0x12b   :  { %v350_v43 = vadd.f32 %v1036_v42, %v1034_v39 }
 0x12c   :  { %1037 = vtanh.f32 %v288_v50  ;;  %v383_v11 = vpack.c.bf16 %v375_v6, %v375_v6 }
 0x12d   :  { %v351_v48 = vrot.slane %v350_v43, 4 }
 0x12e   :  { %v419_v16 = vunpack.c.l.b16 %v383_v11 }
 0x12f   :  { %v352_v49 = vadd.f32 %v351_v48, %v350_v43 }
 0x130   :  { %v430_v22 = vsel %vm429_vm4, %v419_v16, %v1356_v8  ;;  %v575_v8 = vpop.f32.mrf.mxu2 }
 0x131   :  { %v289_v53 = vpop.f32.mrf.mxu0  ;;  %v353_v54 = vrot.slane %v352_v49, 2 }
 0x132   :  { %v290_v55 = vadd.f32 %v1340_v44, %v289_v53  ;;  %v1038_v60 = vpop.eup %1037  ;;  %v376_v44 = vmul.f32 %v1347_v18, %v349_v3 }
 0x133   :  { %v354_v58 = vadd.f32 %v353_v54, %v352_v49 }
 0x134   :  { %1039 = vtanh.f32 %v290_v55  ;;  %v384_v13 = vpack.c.bf16 %v376_v44, %v376_v44 }
 0x135   :  { %v355_v63 = vrot.slane %v354_v58, 1 }
 0x136   :  { %v420_v19 = vunpack.c.l.b16 %v384_v13 }
 0x137   :  { %v356_v4 = vadd.f32 %v355_v63, %v354_v58 }
 0x138   :  { %v432_v24 = vsel %vm431_vm5, %v420_v19, %v430_v22  ;;  %v578_v36 = vpop.f32.mrf.mxu2 }
 0x139   :  { %v377_v9 = vmul.f32 %v1347_v18, %v356_v4 }
 0x13a   :  { %v1040_v62 = vpop.eup %1039 }
 0x13b   :  { %v357_v0 = vadd.f32 %v1040_v62, %v1038_v60  ;;  %v385_v14 = vpack.c.bf16 %v377_v9, %v377_v9 }
 0x13d   :  { %v358_v2 = vrot.slane %v357_v0, 4  ;;  %v421_v20 = vunpack.c.l.b16 %v385_v14 }
 0x13f   :  { %v359_v5 = vadd.f32 %v358_v2, %v357_v0  ;;  %v434_v25 = vsel %vm433_vm6, %v421_v20, %v432_v24 }
 0x140   :  { %v580_v37 = vpop.f32.mrf.mxu2 }
 0x141   :  { %v360_v7 = vrot.slane %v359_v5, 2 }
 0x143   :  { %v361_v10 = vadd.f32 %v360_v7, %v359_v5 }
 0x145   :  { %v362_v12 = vrot.slane %v361_v10, 1 }
 0x147   :  { %v363_v15 = vadd.f32 %v362_v12, %v361_v10 }
 0x148   :  { %v583_v40 = vpop.f32.mrf.mxu2 }
 0x149   :  { %v378_v17 = vmul.f32 %v1347_v18, %v363_v15  ;;  %v989_v18 = vld [vmem:[#allocation11 + $0x28] sm:$0xff] }
 0x14a   :  { %747 = vmatpush.bf16.msra.mxu3 %v989_v18 }
 0x14b   :  { %v386_v21 = vpack.c.bf16 %v378_v17, %v378_v17 }
 0x14d   :  { %v422_v23 = vunpack.c.l.b16 %v386_v21 }
 0x14e   :  { %748 = vmatpush.bf16.msra.mxu3 %v988_v30 }
 0x14f   :  { %v436_v26 = vsel %vm435_vm7, %v422_v23, %v434_v25 }
 0x150   :  { %v437_v27 = vpack.c.b16 %v436_v26, %v436_v26  ;;  %v585_v48 = vpop.f32.mrf.mxu2 }
 0x152   :  { %495 = vmatmul.bf16.vlgmr.msra.gmra.mxu1 %v437_v27  ;;  %749 = vmatpush.bf16.msra.mxu3 %v987_v32 }
 0x156   :  { %750 = vmatpush.bf16.msra.mxu3 %v986_v33 }
 0x158   :  { %v588_v55 = vpop.f32.mrf.mxu2 }
 0x15a   :  { %751 = vmatpush.bf16.msra.mxu3 %v985_v34 }
 0x15e   :  { %752 = vmatpush.bf16.msra.mxu3 %v984_v35 }
 0x160   :  { %v590_v60 = vpop.f32.mrf.mxu2 }
 0x168   :  { %v593_v0 = vpop.f32.mrf.mxu2 }
 0x170   :  { %v595_v44 = vpop.f32.mrf.mxu2 }
 0x178   :  { %v598_v12 = vpop.f32.mrf.mxu2 }
 0x180   :  { %v600_v17 = vpop.f32.mrf.mxu2 }
 0x188   :  { %v603_v24 = vpop.f32.mrf.mxu2 }
 0x190   :  { %v605_v29 = vpop.f32.mrf.mxu2 }
 0x1cf   :  { %v496_v39 = vpop.f32.mrf.mxu1 }
 0x1d0   :  { %v1374_v41 = vadd.f32 %v1005_v38, %v496_v39 }
 0x1d2   :  { %v621_v42 = vperm.slane %v1374_v41, 0  ;;  %v614_v47 = vrot.slane %v1374_v41, 1  ;;  %v615_v56 = vrot.slane %v1374_v41, 2  ;;  %v616_v1 = vrot.slane %v1374_v41, 3 }
 0x1d3   :  { %v617_v9 = vrot.slane %v1374_v41, 4  ;;  %v618_v19 = vrot.slane %v1374_v41, 5  ;;  %v619_v27 = vrot.slane %v1374_v41, 6  ;;  %v620_v34 = vrot.slane %v1374_v41, 7 }
 0x1d4   :  { %v637_v43 = vadd.f32 %v621_v42, %v573_v31  ;;  %v638_v45 = vadd.f32 %v621_v42, %v575_v8  ;;  %v622_v50 = vperm.slane %v614_v47, 0  ;;  %v623_v59 = vperm.slane %v615_v56, 0  ;;  %v608_v8 = vpop.f32.mrf.mxu2  ;;  %v1006_v47 = vld [vmem:[%s1401_s8] ss:$0 sm:$0xff]  ;;  %s1262_s8 = smov [#allocation13]  }
 0x1d5   :  { %v624_v4 = vperm.slane %v616_v1, 0  ;;  %v625_v13 = vperm.slane %v617_v9, 0  ;;  %v626_v22 = vperm.slane %v618_v19, 0  ;;  %v627_v30 = vperm.slane %v619_v27, 0  ;;  %s814_s22 = sshll.u32 %s1262_s8, 4  ;;  %s815_s22 = int_to_ptr.vmem [resolvable:$true] %s814_s22 }
 0x1d6   :  { %1041 = vtanh.f32 %v637_v43  ;;  %v639_v53 = vadd.f32 %v622_v50, %v578_v36  ;;  %v640_v54 = vadd.f32 %v622_v50, %v580_v37  ;;  %v641_v62 = vadd.f32 %v623_v59, %v583_v40 }
 0x1d7   :  { %v498_v46 = vpop.f32.mrf.mxu1  ;;  %1043 = vtanh.f32 %v638_v45  ;;  %v642_v63 = vadd.f32 %v623_v59, %v585_v48  ;;  %v643_v6 = vadd.f32 %v624_v4, %v588_v55  ;;  %v644_v7 = vadd.f32 %v624_v4, %v590_v60 }
 0x1d8   :  { %1045 = vtanh.f32 %v639_v53  ;;  %v645_v15 = vadd.f32 %v625_v13, %v593_v0  ;;  %v646_v16 = vadd.f32 %v625_v13, %v595_v44  ;;  %v647_v25 = vadd.f32 %v626_v22, %v598_v12 }
 0x1d9   :  { %1047 = vtanh.f32 %v640_v54  ;;  %v648_v26 = vadd.f32 %v626_v22, %v600_v17  ;;  %v649_v32 = vadd.f32 %v627_v30, %v603_v24  ;;  %v650_v33 = vadd.f32 %v627_v30, %v605_v29 }
 0x1da   :  { %1049 = vtanh.f32 %v641_v62  ;;  %v628_v37 = vperm.slane %v620_v34, 0 }
 0x1db   :  { %1051 = vtanh.f32 %v642_v63 }
 0x1dc   :  { %v1042_v49 = vpop.eup %1041  ;;  %1053 = vtanh.f32 %v643_v6  ;;  %v610_v38 = vpop.f32.mrf.mxu2  ;;  %v651_v40 = vadd.f32 %v628_v37, %v608_v8 }
 0x1dd   :  { %v1044_v51 = vpop.eup %1043  ;;  %1055 = vtanh.f32 %v644_v7  ;;  %v652_v42 = vadd.f32 %v628_v37, %v610_v38 }
 0x1de   :  { %v669_v52 = vpack.c.bf16 %v1044_v51, %v1042_v49  ;;  %v1046_v57 = vpop.eup %1045  ;;  %1057 = vtanh.f32 %v645_v15 }
 0x1df   :  { %v1048_v58 = vpop.eup %1047  ;;  %1059 = vtanh.f32 %v646_v16 }
 0x1e0   :  { %753 = vmatmul.bf16.vlgmr.msra.gmra.mxu3 %v669_v52  ;;  %v670_v61 = vpack.c.bf16 %v1048_v58, %v1046_v57  ;;  %v1050_v2 = vpop.eup %1049  ;;  %1061 = vtanh.f32 %v647_v25 }
 0x1e1   :  { %v1052_v3 = vpop.eup %1051  ;;  %1063 = vtanh.f32 %v648_v26 }
 0x1e2   :  { %v671_v5 = vpack.c.bf16 %v1052_v3, %v1050_v2  ;;  %v1054_v10 = vpop.eup %1053  ;;  %1065 = vtanh.f32 %v649_v32 }
 0x1e3   :  { %v1056_v11 = vpop.eup %1055  ;;  %1067 = vtanh.f32 %v650_v33 }
 0x1e4   :  { %v672_v14 = vpack.c.bf16 %v1056_v11, %v1054_v10  ;;  %v1058_v20 = vpop.eup %1057  ;;  %1069 = vtanh.f32 %v651_v40 }
 0x1e5   :  { %v1060_v21 = vpop.eup %1059  ;;  %1071 = vtanh.f32 %v652_v42 }
 0x1e6   :  { %v673_v23 = vpack.c.bf16 %v1060_v21, %v1058_v20  ;;  %v1062_v28 = vpop.eup %1061 }
 0x1e7   :  { %v1064_v18 = vpop.eup %1063 }
 0x1e8   :  { %v674_v31 = vpack.c.bf16 %v1064_v18, %v1062_v28  ;;  %v1066_v35 = vpop.eup %1065 }
 0x1e9   :  { %v1068_v36 = vpop.eup %1067 }
 0x1ea   :  { %v675_v39 = vpack.c.bf16 %v1068_v36, %v1066_v35  ;;  %v1070_v43 = vpop.eup %1069 }
 0x1eb   :  { %v1072_v45 = vpop.eup %1071 }
 0x1ec   :  { %v676_v46 = vpack.c.bf16 %v1072_v45, %v1070_v43 }
 0x1f0   :  { %758 = vmatmul.bf16.gmra.mxu3 %v670_v61 }
 0x200   :  { %763 = vmatmul.bf16.gmra.mxu3 %v671_v5 }
 0x210   :  { %768 = vmatmul.bf16.gmra.mxu3 %v672_v14 }
 0x220   :  { %773 = vmatmul.bf16.gmra.mxu3 %v673_v23 }
 0x230   :  { %778 = vmatmul.bf16.gmra.mxu3 %v674_v31 }
 0x240   :  { %783 = vmatmul.bf16.gmra.mxu3 %v675_v39 }
 0x250   :  { %788 = vmatmul.bf16.gmra.mxu3 %v676_v46 }
 0x263   :  { %v754_v48 = vpop.f32.mrf.mxu3 }
 0x264   :  { %v755_v41 = vadd.f32 %v1006_v47, %v754_v48 }
 0x266   :  { %794 = vst [vmem:[#allocation13] sm:$0xff] %v755_v41 }
 0x26b   :  { %v756_v49 = vpop.f32.mrf.mxu3 }
 0x26c   :  { %v757_v50 = vadd.f32 %v1006_v47, %v756_v49 }
 0x26e   :  { %795 = vst [vmem:[#allocation13 + $0x8] sm:$0xff] %v757_v50 }
 0x273   :  { %v759_v51 = vpop.f32.mrf.mxu3 }
 0x274   :  { %v760_v52 = vadd.f32 %v1006_v47, %v759_v51 }
 0x276   :  { %796 = vst [vmem:[#allocation13 + $0x10] sm:$0xff] %v760_v52 }
 0x27b   :  { %v761_v53 = vpop.f32.mrf.mxu3 }
 0x27c   :  { %v762_v54 = vadd.f32 %v1006_v47, %v761_v53 }
 0x27e   :  { %797 = vst [vmem:[#allocation13 + $0x18] sm:$0xff] %v762_v54 }
 0x283   :  { %v764_v55 = vpop.f32.mrf.mxu3 }
 0x284   :  { %v765_v56 = vadd.f32 %v1006_v47, %v764_v55 }
 0x286   :  { %798 = vst [vmem:[#allocation13 + $0x20] sm:$0xff] %v765_v56 }
 0x28b   :  { %v766_v57 = vpop.f32.mrf.mxu3 }
 0x28c   :  { %v767_v58 = vadd.f32 %v1006_v47, %v766_v57 }
 0x28e   :  { %799 = vst [vmem:[#allocation13 + $0x28] sm:$0xff] %v767_v58 }
 0x293   :  { %v769_v59 = vpop.f32.mrf.mxu3 }
 0x294   :  { %v770_v60 = vadd.f32 %v1006_v47, %v769_v59 }
 0x296   :  { %800 = vst [vmem:[#allocation13 + $0x30] sm:$0xff] %v770_v60 }
 0x29b   :  { %v771_v61 = vpop.f32.mrf.mxu3 }
 0x29c   :  { %v772_v62 = vadd.f32 %v1006_v47, %v771_v61 }
 0x29e   :  { %801 = vst [vmem:[#allocation13 + $0x38] sm:$0xff] %v772_v62 }
 0x2a3   :  { %v774_v63 = vpop.f32.mrf.mxu3 }
 0x2a4   :  { %v775_v0 = vadd.f32 %v1006_v47, %v774_v63 }
 0x2a6   :  { %802 = vst [vmem:[#allocation13 + $0x40] sm:$0xff] %v775_v0 }
 0x2ab   :  { %v776_v1 = vpop.f32.mrf.mxu3 }
 0x2ac   :  { %v777_v2 = vadd.f32 %v1006_v47, %v776_v1 }
 0x2ae   :  { %803 = vst [vmem:[#allocation13 + $0x48] sm:$0xff] %v777_v2 }
 0x2b3   :  { %v779_v3 = vpop.f32.mrf.mxu3 }
 0x2b4   :  { %v780_v4 = vadd.f32 %v1006_v47, %v779_v3 }
 0x2b6   :  { %804 = vst [vmem:[#allocation13 + $0x50] sm:$0xff] %v780_v4 }
 0x2bb   :  { %v781_v5 = vpop.f32.mrf.mxu3 }
 0x2bc   :  { %v782_v6 = vadd.f32 %v1006_v47, %v781_v5 }
 0x2be   :  { %805 = vst [vmem:[#allocation13 + $0x58] sm:$0xff] %v782_v6 }
 0x2c3   :  { %v784_v7 = vpop.f32.mrf.mxu3 }
 0x2c4   :  { %v785_v44 = vadd.f32 %v1006_v47, %v784_v7 }
 0x2c6   :  { %806 = vst [vmem:[#allocation13 + $0x60] sm:$0xff] %v785_v44 }
 0x2cb   :  { %v786_v9 = vpop.f32.mrf.mxu3 }
 0x2cc   :  { %v787_v10 = vadd.f32 %v1006_v47, %v786_v9 }
 0x2ce   :  { %807 = vst [vmem:[#allocation13 + $0x68] sm:$0xff] %v787_v10 }
 0x2d3   :  { %v789_v11 = vpop.f32.mrf.mxu3 }
 0x2d4   :  { %v790_v12 = vadd.f32 %v1006_v47, %v789_v11 }
 0x2d6   :  { %808 = vst [vmem:[#allocation13 + $0x70] sm:$0xff] %v790_v12 }
 0x2db   :  { %v791_v13 = vpop.f32.mrf.mxu3 }
 0x2dc   :  { %v792_v14 = vadd.f32 %v1006_v47, %v791_v13 }
 0x2de   :  { %809 = vst [vmem:[#allocation13 + $0x78] sm:$0xff] %v792_v14 }
 0x2df   :  { %822 = dma.vmem_to_hbm [thread:$0]  %s815_s22, 2048, %s817_s24, [#allocation4], %s1252_s14, %s1252_s14, %s1253_s15  }
 0x2e0   :  { %1249 = dma.done.wait [#allocation4], 2048  }
 0x2e1   :  { %1250 = vsyncadd [#allocation4], 4294965248 }
 0x2e2   :  { %827 = vsyncpa [#allocation3], 1 }
 0x2e3   :  { %828 = vsyncpa [#allocation6], 1 }
 0x2e4   :  { %829 = vsyncpa [#allocation9], 1 }
 0x2e5   :  { %830 = vsyncpa [#allocation12], 1 }
 0x2e6   :  { %831 = vsyncpa [#allocation4], 1 }

</bundles_post_ra>
